<compile_context>
chip_gen: v7x
topology: tpu7x:2x2x1
jax: 0.10.0
libtpu: 0.0.40
codegen_flags: <defaults>
</compile_context>

<pallas_src>
import functools
import math

import jax
import jax.numpy as jnp
from jax.experimental import pallas as pl
from jax.experimental.pallas import tpu as pltpu

LANES = 128              # lane width
SUBLANES = 8             # sublane tile height (vreg rows)
MAX_BLOCK_ROWS = 4096    # (4096, 128) f32 = 2 MiB per input per pipeline buffer
NUM_SHARDS = 2           # leading "parallel" axis -> both TCs on v7x


def _charbonnier_kernel(x_ref, y_ref, o_ref, *, eps, rows, block_rows,
                        steps_per_shard):
    c = pl.program_id(0)   # parallel shard (TensorCore on v7x)
    i = pl.program_id(1)   # sequential reduction step within the shard

    @pl.when(i == 0)
    def _init():
        o_ref[...] = jnp.zeros_like(o_ref)

    x = x_ref[...].astype(jnp.float32)
    y = y_ref[...].astype(jnp.float32)
    d = x - y
    val = jnp.sqrt(d * d + eps)                       # (block_rows, LANES)

    b = c * steps_per_shard + i                       # global block index
    full_blocks = rows // block_rows                  # static

    # Hot path: full block, no masking, pure VPU adds into the (8,128) acc.
    @pl.when(b < full_blocks)
    def _full():
        o_ref[...] += jnp.sum(val.reshape(-1, SUBLANES, LANES), axis=0)

    # Cold path (runs at most once per shard): partial or empty trailing
    # block — mask rows past the end of the array.
    @pl.when(b >= full_blocks)
    def _tail():
        valid = rows - b * block_rows                 # <= 0 for empty blocks
        row_ids = jax.lax.broadcasted_iota(jnp.int32, val.shape, 0)
        masked = jnp.where(row_ids < valid, val, 0.0)
        o_ref[...] += jnp.sum(masked.reshape(-1, SUBLANES, LANES), axis=0)


def charbonnier_loss2(x, y, eps=1e-6):
    assert x.shape == y.shape
    n = x.size

    xf = jnp.ravel(x)
    yf = jnp.ravel(y)

    # Pad only to the next 8*128 boundary so the data reshapes to (rows, 128)
    # with rows % 8 == 0.  This is a no-op (no HBM copy) whenever n is already
    # 1024-aligned; padded zeros each contribute sqrt(0 + eps) and are
    # subtracted back out below.
    pad = (-n) % (SUBLANES * LANES)
    if pad:
        xf = jnp.pad(xf, (0, pad))
        yf = jnp.pad(yf, (0, pad))
    rows = (n + pad) // LANES
    xf = xf.reshape(rows, LANES)
    yf = yf.reshape(rows, LANES)

    block_rows = min(MAX_BLOCK_ROWS, rows)            # multiple of 8, <= rows
    total_blocks = pl.cdiv(rows, block_rows)
    num_shards = NUM_SHARDS if total_blocks >= NUM_SHARDS else 1
    steps = pl.cdiv(total_blocks, num_shards)

    def in_map(c, i):
        # Clamp so a shard whose last step runs past the end re-reads a valid
        # block; its contribution is masked to zero inside the kernel.
        return (jnp.minimum(c * steps + i, total_blocks - 1), 0)

    kernel = functools.partial(
        _charbonnier_kernel, eps=float(eps), rows=rows,
        block_rows=block_rows, steps_per_shard=steps)

    partials = pl.pallas_call(
        kernel,
        out_shape=jax.ShapeDtypeStruct((num_shards * SUBLANES, LANES),
                                       jnp.float32),
        grid_spec=pltpu.PrefetchScalarGridSpec(
            num_scalar_prefetch=0,
            grid=(num_shards, steps),
            in_specs=[
                # NOTE: if DMA is still exposed after profiling, try
                # pipeline_mode=pl.Buffered(3) here (fits all gens' VMEM).
                pl.BlockSpec((block_rows, LANES), in_map),
                pl.BlockSpec((block_rows, LANES), in_map),
            ],
            out_specs=pl.BlockSpec((SUBLANES, LANES), lambda c, i: (c, 0)),
        ),
        compiler_params=pltpu.CompilerParams(
            dimension_semantics=("parallel", "arbitrary"),
            vmem_limit_bytes=32 * 1024 * 1024,   # fits v5e/v6e/v7x scoped VMEM
        ),
    )(xf, yf)

    total = jnp.sum(partials)                         # tiny (<= 16x128) reduce
    if pad:
        total = total - pad * math.sqrt(eps)          # remove pad contributions
    return total / n


def _reference(x, y, eps):
    diff = x - y
    return jnp.mean(jnp.sqrt(diff * diff + eps))


if __name__ == "__main__":
    key = jax.random.PRNGKey(0)

    # 1) Small NCHW case (module's intended usage), 1024-aligned -> no pad.
    kx, ky, key = jax.random.split(key, 3)
    x = jax.random.normal(kx, (2, 4, 16, 16), dtype=jnp.float32)
    y = jax.random.normal(ky, (2, 4, 16, 16), dtype=jnp.float32)
    loss = charbonnier_loss2(x, y, eps=1e-6)
    jax.block_until_ready(loss)
    ref = _reference(x, y, 1e-6)
    assert jnp.allclose(loss, ref, rtol=1e-5, atol=1e-6), (loss, ref)

    # 2) Unaligned size -> exercises the pad + analytic correction path.
    kx, ky, key = jax.random.split(key, 3)
    x2 = jax.random.normal(kx, (2, 3, 17, 19), dtype=jnp.float32)
    y2 = jax.random.normal(ky, (2, 3, 17, 19), dtype=jnp.float32)
    loss2 = charbonnier_loss2(x2, y2, eps=1e-6)
    jax.block_until_ready(loss2)
    ref2 = _reference(x2, y2, 1e-6)
    assert jnp.allclose(loss2, ref2, rtol=1e-5, atol=1e-6), (loss2, ref2)

    # 3) Multi-block case -> exercises 2-way sharding, full blocks, a partial
    #    trailing block and a clamped/empty block.
    kx, ky, key = jax.random.split(key, 3)
    x3 = jax.random.normal(kx, (100, 100, 128), dtype=jnp.float32)
    y3 = jax.random.normal(ky, (100, 100, 128), dtype=jnp.float32)
    loss3 = charbonnier_loss2(x3, y3, eps=1e-6)
    jax.block_until_ready(loss3)
    ref3 = _reference(x3, y3, 1e-6)
    assert jnp.allclose(loss3, ref3, rtol=1e-4, atol=1e-6), (loss3, ref3)

    print("KERNEL_OK")
</pallas_src>

<mosaic_0001>
module attributes {stable_mosaic.version = 11 : i64} {
  func.func @_charbonnier_kernel(%arg0: i32, %arg1: i32, %arg2: memref<16x128xf32, #tpu.memory_space<vmem>>, %arg3: memref<16x128xf32, #tpu.memory_space<vmem>>, %arg4: memref<8x128xf32, #tpu.memory_space<vmem>>) attributes {dimension_semantics = [#tpu.dimension_semantics<parallel>, #tpu.dimension_semantics<arbitrary>], iteration_bounds = array<i64: 1, 1>, scalar_prefetch = 0 : i64, scratch_operands = 0 : i64, tpu.core_type = #tpu.core_type<tc>, window_params = [{transform_indices = @transform_0, window_bounds = array<i64: 16, 128>}, {transform_indices = @transform_1, window_bounds = array<i64: 16, 128>}, {transform_indices = @transform_2, window_bounds = array<i64: 8, 128>}]} {
    %c0_i32 = arith.constant 0 : i32
    %0 = arith.cmpi eq, %arg1, %c0_i32 : i32
    %1 = arith.extui %0 : i1 to i32
    %c0_i32_0 = arith.constant 0 : i32
    %2 = arith.cmpi ne, %1, %c0_i32_0 : i32
    scf.if %2 {
      %cst_8 = arith.constant 0.000000e+00 : f32
      %18 = vector.broadcast %cst_8 : f32 to vector<8x128xf32>
      %c0_9 = arith.constant 0 : index
      %c0_10 = arith.constant 0 : index
      %19 = vector.load %arg4[%c0_9, %c0_10] : memref<8x128xf32, #tpu.memory_space<vmem>>, vector<8x128xf32>
      tpu.vector_store %arg4[%c0_9, %c0_10], %18 {strides = array<i32>} : memref<8x128xf32, #tpu.memory_space<vmem>>, vector<8x128xf32>,
    } else {
    }
    %c0 = arith.constant 0 : index
    %c0_1 = arith.constant 0 : index
    %3 = vector.load %arg2[%c0, %c0_1] : memref<16x128xf32, #tpu.memory_space<vmem>>, vector<16x128xf32>
    %c0_2 = arith.constant 0 : index
    %c0_3 = arith.constant 0 : index
    %4 = vector.load %arg3[%c0_2, %c0_3] : memref<16x128xf32, #tpu.memory_space<vmem>>, vector<16x128xf32>
    %5 = arith.subf %3, %4 : vector<16x128xf32>
    %6 = arith.mulf %5, %5 : vector<16x128xf32>
    %cst = arith.constant 9.99999997E-7 : f32
    %7 = vector.broadcast %cst : f32 to vector<16x128xf32>
    %8 = arith.addf %6, %7 : vector<16x128xf32>
    %9 = math.sqrt %8 : vector<16x128xf32>
    %c1_i32 = arith.constant 1 : i32
    %10 = arith.muli %arg0, %c1_i32 : i32
    %11 = arith.addi %10, %arg1 : i32
    %c1_i32_4 = arith.constant 1 : i32
    %12 = arith.cmpi slt, %11, %c1_i32_4 : i32
    %13 = arith.extui %12 : i1 to i32
    %c0_i32_5 = arith.constant 0 : i32
    %14 = arith.cmpi ne, %13, %c0_i32_5 : i32
    scf.if %14 {
      %c0_8 = arith.constant 0 : index
      %c0_9 = arith.constant 0 : index
      %18 = vector.load %arg4[%c0_8, %c0_9] : memref<8x128xf32, #tpu.memory_space<vmem>>, vector<8x128xf32>
      %19 = vector.shape_cast %9 : vector<16x128xf32> to vector<2x8x128xf32>
      %cst_10 = arith.constant dense<0.000000e+00> : vector<8x128xf32>
      %20 = vector.multi_reduction <add>, %19, %cst_10 [0] : vector<2x8x128xf32> to vector<8x128xf32>
      %21 = arith.addf %18, %20 : vector<8x128xf32>
      %c0_11 = arith.constant 0 : index
      %c0_12 = arith.constant 0 : index
      %22 = vector.load %arg4[%c0_11, %c0_12] : memref<8x128xf32, #tpu.memory_space<vmem>>, vector<8x128xf32>
      tpu.vector_store %arg4[%c0_11, %c0_12], %21 {strides = array<i32>} : memref<8x128xf32, #tpu.memory_space<vmem>>, vector<8x128xf32>,
    } else {
    }
    %c1_i32_6 = arith.constant 1 : i32
    %15 = arith.cmpi sge, %11, %c1_i32_6 : i32
    %16 = arith.extui %15 : i1 to i32
    %c0_i32_7 = arith.constant 0 : i32
    %17 = arith.cmpi ne, %16, %c0_i32_7 : i32
    scf.if %17 {
      %c16_i32 = arith.constant 16 : i32
      %18 = arith.muli %11, %c16_i32 : i32
      %c16_i32_8 = arith.constant 16 : i32
      %19 = arith.subi %c16_i32_8, %18 : i32
      %20 = tpu.iota {dimensions = array<i32: 0>} : vector<16x128xi32>
      %21 = vector.broadcast %19 : i32 to vector<16x128xi32>
      %22 = arith.cmpi slt, %20, %21 : vector<16x128xi32>
      %cst_9 = arith.constant 0.000000e+00 : f32
      %23 = vector.broadcast %cst_9 : f32 to vector<16x128xf32>
      %24 = arith.select %22, %9, %23 : vector<16x128xi1>, vector<16x128xf32>
      %c0_10 = arith.constant 0 : index
      %c0_11 = arith.constant 0 : index
      %25 = vector.load %arg4[%c0_10, %c0_11] : memref<8x128xf32, #tpu.memory_space<vmem>>, vector<8x128xf32>
      %26 = vector.shape_cast %24 : vector<16x128xf32> to vector<2x8x128xf32>
      %cst_12 = arith.constant dense<0.000000e+00> : vector<8x128xf32>
      %27 = vector.multi_reduction <add>, %26, %cst_12 [0] : vector<2x8x128xf32> to vector<8x128xf32>
      %28 = arith.addf %25, %27 : vector<8x128xf32>
      %c0_13 = arith.constant 0 : index
      %c0_14 = arith.constant 0 : index
      %29 = vector.load %arg4[%c0_13, %c0_14] : memref<8x128xf32, #tpu.memory_space<vmem>>, vector<8x128xf32>
      tpu.vector_store %arg4[%c0_13, %c0_14], %28 {strides = array<i32>} : memref<8x128xf32, #tpu.memory_space<vmem>>, vector<8x128xf32>,
    } else {
    }
    return
  }
  func.func @transform_0(%arg0: i32, %arg1: i32) -> (i32, i32) {
    %c1_i32 = arith.constant 1 : i32
    %0 = arith.muli %arg0, %c1_i32 : i32
    %1 = arith.addi %0, %arg1 : i32
    %c0_i32 = arith.constant 0 : i32
    %2 = arith.minsi %1, %c0_i32 : i32
    %c0_i32_0 = arith.constant 0 : i32
    %c0_i32_1 = arith.constant 0 : i32
    return %2, %c0_i32_0 : i32, i32
  }
  func.func @transform_1(%arg0: i32, %arg1: i32) -> (i32, i32) {
    %c1_i32 = arith.constant 1 : i32
    %0 = arith.muli %arg0, %c1_i32 : i32
    %1 = arith.addi %0, %arg1 : i32
    %c0_i32 = arith.constant 0 : i32
    %2 = arith.minsi %1, %c0_i32 : i32
    %c0_i32_0 = arith.constant 0 : i32
    %c0_i32_1 = arith.constant 0 : i32
    return %2, %c0_i32_0 : i32, i32
  }
  func.func @transform_2(%arg0: i32, %arg1: i32) -> (i32, i32) {
    %c0_i32 = arith.constant 0 : i32
    %c0_i32_0 = arith.constant 0 : i32
    return %arg0, %c0_i32 : i32, i32
  }
}

</mosaic_0001>

<bundles_post_ra>
// kernel: tpu_custom_call.1
= control target key start
LH: loop header
LB: loop body
LE: loop exit
PB: predicated region body
PF: predicated region fallthrough
CT: control target
= control target key end

     0   :  { %7 = vsyncpa [#allocation3], 0  ;;  %s274_s0 = inlined_call_operand.hbm [shape: f32[16,128], index: 0, kind: input, shape index: {}]   ;;  %s275_s1 = inlined_call_operand.hbm [shape: f32[16,128], index: 1, kind: input, shape index: {}]   ;;  %s276_s2 = inlined_call_operand.hbm [shape: f32[8,128], index: 2, kind: output, shape index: {}]  }
   0x1   :  { %8 = vsyncpa [#allocation6], 0 }
   0x2   :  { %9 = vsyncpa [#allocation4], 0  ;;  %s218_s9 = smov [#allocation2]   ;;  %s146_s13 = scalar_lea.hbm %s274_s0, 256 }
   0x3   :  { %s21_s10 = sshll.u32 %s218_s9, 4  ;;  %p147_p0 = scmp.ne.s32.totalorder %s274_s0, %s146_s13  ;;  %s22_s10 = int_to_ptr.vmem [resolvable:$true] %s21_s10 }
   0x4   :  { %p150_p1 = scmp.lt.u32.totalorder %s146_s13, %s274_s0 }
   0x6   :  { %p152_p2 = pnand %p150_p1, %p147_p0 }
   0x8   :  { %155 = shalt.err (!%p152_p2)
}
   0x9   :  { %s156_s18 = scalar_lea.vmem %s22_s10, 256  ;;  %p161_p4 = scmp.lt.s32.totalorder %s22_s10, %s22_s10 }
   0xa   :  { %p157_p3 = scmp.ne.s32.totalorder %s22_s10, %s156_s18  ;;  %p162_p5 = scmp.lt.s32.totalorder %s156_s18, %s156_s18 }
   0xc   :  { %p163_p6 = por %p162_p5, %p161_p4 }
   0xe   :  { %p164_p7 = pnand %p163_p6, %p157_p3 }
  0x10   :  { %167 = shalt.err (!%p164_p7)
}
  0x11   :  { %s219_s19 = smov 128   ;;  %s220_s20 = smov 8  }
  0x12   :  { %27 = dma.hbm_to_vmem [thread:$0]  %s274_s0, 256, %s22_s10, [#allocation3], %s219_s19, %s219_s19, %s220_s20  }
  0x13   :  { %s221_s23 = smov [#allocation5]   ;;  %s168_s27 = scalar_lea.hbm %s275_s1, 256 }
  0x14   :  { %s39_s24 = sshll.u32 %s221_s23, 4  ;;  %p169_p8 = scmp.ne.s32.totalorder %s275_s1, %s168_s27  ;;  %s40_s24 = int_to_ptr.vmem [resolvable:$true] %s39_s24 }
  0x15   :  { %p172_p9 = scmp.lt.u32.totalorder %s168_s27, %s275_s1 }
  0x17   :  { %p174_p10 = pnand %p172_p9, %p169_p8 }
  0x19   :  { %177 = shalt.err (!%p174_p10)
}
  0x1a   :  { %s178_s4 = scalar_lea.vmem %s40_s24, 256  ;;  %p183_p12 = scmp.lt.s32.totalorder %s40_s24, %s40_s24 }
  0x1b   :  { %p179_p11 = scmp.ne.s32.totalorder %s40_s24, %s178_s4  ;;  %p184_p13 = scmp.lt.s32.totalorder %s178_s4, %s178_s4 }
  0x1d   :  { %p185_p0 = por %p184_p13, %p183_p12 }
  0x1f   :  { %p186_p1 = pnand %p185_p0, %p179_p11 }
  0x21   :  { %189 = shalt.err (!%p186_p1)
}
  0x22   :  { %45 = dma.hbm_to_vmem [thread:$0]  %s275_s1, 256, %s40_s24, [#allocation6], %s219_s19, %s219_s19, %s220_s20  }
  0x23   :  { %212 = dma.done.wait [#allocation3], 256  }
  0x24   :  { %213 = vsyncadd [#allocation3], 4294967040 }
  0x25   :  { %214 = dma.done.wait [#allocation6], 256  }
  0x26   :  { %215 = vsyncadd [#allocation6], 4294967040  ;;  %v65_v0 = vld [vmem:[#allocation2] sm:$0xff]  ;;  %v66_v1 = vld [vmem:[#allocation2 + $0x8] sm:$0xff]  ;;  %s222_s1 = smov [#allocation7]  }
  0x27   :  { %v67_v2 = vld [vmem:[#allocation5] sm:$0xff]  ;;  %v68_v3 = vld [vmem:[#allocation5 + $0x8] sm:$0xff]  ;;  %s122_s6 = sshll.u32 %s222_s1, 4  ;;  %s123_s6 = int_to_ptr.vmem [resolvable:$true] %s122_s6 }
  0x28   :  { %v69_v4 = vsub.f32 %v65_v0, %v67_v2  ;;  %v70_v5 = vsub.f32 %v66_v1, %v68_v3  ;;  %s190_s7 = scalar_lea.vmem %s123_s6, 128  ;;  %p195_p3 = scmp.lt.s32.totalorder %s123_s6, %s123_s6 }
  0x29   :  { %p191_p2 = scmp.ne.s32.totalorder %s123_s6, %s190_s7  ;;  %p196_p4 = scmp.lt.s32.totalorder %s190_s7, %s190_s7 }
  0x2a   :  { %v71_v6 = vmul.f32 %v69_v4, %v69_v4  ;;  %v72_v7 = vmul.f32 %v70_v5, %v70_v5 }
  0x2b   :  { %p197_p5 = por %p196_p4, %p195_p3 }
  0x2c   :  { %v73_v8 = vadd.f32 1e-06, %v71_v6  ;;  %v74_v9 = vadd.f32 1e-06, %v72_v7 }
  0x2d   :  { %p198_p6 = pnand %p197_p5, %p191_p2 }
  0x2e   :  { %142 = vrsqrt.f32 %v73_v8  ;;  %vm77_vm0 = vcmp.eq.f32.partialorder %v73_v8, inf  ;;  %v80_v11 = vand.u32 2147483648, %v73_v8  ;;  %vm79_vm1 = vcmp.eq.f32.partialorder %v73_v8, 0.0 }
  0x2f   :  { %144 = vrsqrt.f32 %v74_v9  ;;  %vm84_vm2 = vcmp.eq.f32.partialorder %v74_v9, inf  ;;  %v87_v14 = vand.u32 2147483648, %v74_v9  ;;  %vm86_vm3 = vcmp.eq.f32.partialorder %v74_v9, 0.0 }
  0x38   :  { %v143_v10 = vpop.eup %142 }
  0x39   :  { %v145_v12 = vpop.eup %144  ;;  %v76_v13 = vmul.f32 %v143_v10, %v73_v8 }
  0x3a   :  { %v83_v15 = vmul.f32 %v145_v12, %v74_v9 }
  0x3b   :  { %v78_v16 = vsel %vm77_vm0, %v73_v8, %v76_v13 }
  0x3c   :  { %v81_v17 = vsel %vm79_vm1, %v80_v11, %v78_v16  ;;  %v85_v18 = vsel %vm84_vm2, %v74_v9, %v83_v15 }
  0x3d   :  { %v88_v19 = vsel %vm86_vm3, %v87_v14, %v85_v18 }
  0x3e   :  { %v95_v20 = vadd.f32 %v88_v19, %v81_v17 }
  0x40   :  { %97 = vst [vmem:[#allocation7] sm:$0xff] %v95_v20 }
  0x41   :  { %201 = shalt.err (!%p198_p6)
}
  0x42   :  { %s202_s10 = scalar_lea.hbm %s276_s2, 128 }
  0x43   :  { %p203_p7 = scmp.ne.s32.totalorder %s276_s2, %s202_s10  ;;  %p206_p8 = scmp.lt.u32.totalorder %s202_s10, %s276_s2 }
  0x45   :  { %p208_p9 = pnand %p206_p8, %p203_p7 }
  0x47   :  { %211 = shalt.err (!%p208_p9)
}
  0x48   :  { %125 = dma.vmem_to_hbm [thread:$0]  %s123_s6, 128, %s276_s2, [#allocation4]  }
  0x49   :  { %216 = dma.done.wait [#allocation4], 128  }
  0x4a   :  { %217 = vsyncadd [#allocation4], 4294967168 }
  0x4b   :  { %129 = vsyncpa [#allocation3], 1 }
  0x4c   :  { %130 = vsyncpa [#allocation6], 1 }
  0x4d   :  { %131 = vsyncpa [#allocation4], 1 }

</bundles_post_ra>
